<compile_context>
chip_gen: v6e
topology: v6e:2x2x1
jax: 0.10.0
libtpu: 0.0.40
codegen_flags: <defaults>
</compile_context>

<pallas_src>
import functools

import jax
import jax.numpy as jnp
from jax.experimental import pallas as pl
from jax.experimental.pallas import tpu as pltpu

EPS = 1e-5


# ---------------------------------------------------------------------------
# kernels
# ---------------------------------------------------------------------------
def _conv_bn_stats_kernel(*refs, hp, apply_pre):
    # apply_pre=False: x_ref, w_ref, y_ref, stats_ref
    # apply_pre=True : x_ref, w_ref, sc_ref, sh_ref, y_ref, stats_ref
    #
    # x_ref    : (nb*hp, 2*W*C)    packed activation slab (2 image rows / row)
    # w_ref    : (3*2*W*C, 2*W*C)  band weights [B_up; B_mid; B_dn]
    # sc/sh    : (1, 2*W*C)        fused scale/shift of the previous BN (tiled)
    # y_ref    : (nb*hp, 2*W*C)    conv output
    # stats_ref: (2, 2*W*C)        per-step partial [sum; sum of squares]
    if apply_pre:
        x_ref, w_ref, sc_ref, sh_ref, y_ref, stats_ref = refs
    else:
        x_ref, w_ref, y_ref, stats_ref = refs

    x = x_ref[...]
    if apply_pre:
        # bn1 (fused scale/shift) + relu applied on the fly before conv2.
        x = jnp.maximum(x * sc_ref[...] + sh_ref[...], 0.0)

    m = x.shape[0]
    row = jax.lax.broadcasted_iota(jnp.int32, (m, 1), 0)
    # packed row above / below; rows at image-top / image-bottom boundaries are
    # zeroed (== SAME zero padding along H, and no bleed between stacked images).
    x_up = jnp.where(row % hp == 0, 0.0, pltpu.roll(x, 1, axis=0))
    x_dn = jnp.where(row % hp == hp - 1, 0.0, pltpu.roll(x, m - 1, axis=0))

    # single MXU matmul, K = 3 * 2*W*C (lane concat of multiples of 128 is free)
    xin = jnp.concatenate([x_up, x, x_dn], axis=-1)
    y = jnp.dot(xin, w_ref[...], preferred_element_type=jnp.float32)

    y_ref[...] = y
    # one-pass BN partials per lane (folded to per-channel in the wrapper)
    stats_ref[...] = jnp.concatenate(
        [jnp.sum(y, axis=0, keepdims=True),
         jnp.sum(y * y, axis=0, keepdims=True)], axis=0)


# ---------------------------------------------------------------------------
# wrapper helpers
# ---------------------------------------------------------------------------
def _band_weights(w_hwio, W):
    # (3, 3, Cin, Cout) -> (3*2*W*C, 2*W*C) band weight for the packed
    # two-rows-per-lane-row layout; kw taps + W zero padding folded in.
    C = w_hwio.shape[-1]
    A = []
    for kh in range(3):
        a = jnp.zeros((W * C, W * C), jnp.float32)
        for kw in range(3):
            shift = jnp.eye(W, k=1 - kw, dtype=jnp.float32)   # in-row -> out-row
            a = a + jnp.kron(shift, w_hwio[kh, kw].astype(jnp.float32))
        A.append(a)
    a0, a1, a2 = A                      # y[h] += x[h-1]@a0 + x[h]@a1 + x[h+1]@a2
    z = jnp.zeros_like(a0)
    b_up = jnp.block([[z, z], [a0, z]])      # from packed row p-1
    b_mid = jnp.block([[a1, a0], [a2, a1]])  # from packed row p
    b_dn = jnp.block([[z, a2], [z, z]])      # from packed row p+1
    return jnp.concatenate([b_up, b_mid, b_dn], axis=0)


def _bn_affine(stats, gamma, beta, m_total, W, C):
    # stats: (steps, 2, 2*W*C) partial sums -> fused per-channel scale/shift,
    # tiled back to the (1, 2*W*C) packed lane layout used inside the kernels.
    tot = jnp.sum(stats, axis=0)                       # (2, 2*W*C)
    s = tot[0].reshape(2 * W, C).sum(axis=0)           # (C,)
    ss = tot[1].reshape(2 * W, C).sum(axis=0)          # (C,)
    mean = s / m_total
    var = ss / m_total - mean * mean                   # biased var (train-mode BN)
    scale = gamma * jax.lax.rsqrt(var + EPS)
    shift = beta - mean * scale
    return (jnp.tile(scale, 2 * W).reshape(1, 2 * W * C),
            jnp.tile(shift, 2 * W).reshape(1, 2 * W * C))


@jax.jit
def residual_block(x_nchw, w1, g1, bt1, w2, g2, bt2):
    N, C, H, W = x_nchw.shape
    assert H % 2 == 0, "packed layout assumes even H"
    HP = H // 2
    L = 2 * W * C                 # packed lane width (=128 for the test shape)
    m_total = N * H * W

    # NCHW -> lane-dense packed slab (N*H/2, 2*W*C)
    xp = jnp.transpose(x_nchw, (0, 2, 3, 1)).astype(jnp.float32).reshape(N * HP, L)

    A1 = _band_weights(w1, W)     # (3L, L)
    A2 = _band_weights(w2, W)

    # batch block: grow matmul M toward ~256 rows, but keep >=2 grid steps when
    # N >= 2 so both TensorCores get work on v7x.
    nb = max(1, min(N, 256 // max(HP, 1)))
    if N >= 2:
        nb = min(nb, max(1, N // 2))
    while N % nb:
        nb -= 1
    steps = N // nb

    act_spec = pl.BlockSpec((nb * HP, L), lambda n: (n, 0))
    wgt_spec = pl.BlockSpec((3 * L, L), lambda n: (0, 0))
    vec_spec = pl.BlockSpec((1, L), lambda n: (0, 0))
    st_spec = pl.BlockSpec((None, 2, L), lambda n: (n, 0, 0))

    act_shape = jax.ShapeDtypeStruct((N * HP, L), jnp.float32)
    st_shape = jax.ShapeDtypeStruct((steps, 2, L), jnp.float32)

    cparams = pltpu.CompilerParams(
        dimension_semantics=("parallel",),          # shard batch steps across TCs
        vmem_limit_bytes=32 * 1024 * 1024,          # ample headroom on v5e/v6e/v7x
    )

    # pass 1: conv1 + per-step BN1 partial stats
    y1, st1 = pl.pallas_call(
        functools.partial(_conv_bn_stats_kernel, hp=HP, apply_pre=False),
        grid=(steps,),
        in_specs=[act_spec, wgt_spec],
        out_specs=(act_spec, st_spec),
        out_shape=(act_shape, st_shape),
        compiler_params=cparams,
    )(xp, A1)

    sc1, sh1 = _bn_affine(st1, g1, bt1, m_total, W, C)

    # pass 2: (bn1 + relu) fused in, then conv2 + per-step BN2 partial stats
    y2, st2 = pl.pallas_call(
        functools.partial(_conv_bn_stats_kernel, hp=HP, apply_pre=True),
        grid=(steps,),
        in_specs=[act_spec, wgt_spec, vec_spec, vec_spec],
        out_specs=(act_spec, st_spec),
        out_shape=(act_shape, st_shape),
        compiler_params=cparams,
    )(y1, A2, sc1, sh1)

    sc2, sh2 = _bn_affine(st2, g2, bt2, m_total, W, C)

    # bn2 + residual + relu: trivially mem-bound FMA chain; plain jnp so XLA
    # fuses it with the unpack (saves a third pallas_call launch).
    out = jnp.maximum(y2 * sc2 + sh2 + xp, 0.0)
    return jnp.transpose(out.reshape(N, H, W, C), (0, 3, 1, 2))


# ---------------------------------------------------------------------------
# params + pure-JAX reference (PyTorch semantics, conv bias included)
# ---------------------------------------------------------------------------
def make_params(key, channels):
    ks = jax.random.split(key, 4)
    fan_in = channels * 9
    bound = 1.0 / (fan_in ** 0.5)
    w1 = jax.random.uniform(ks[0], (3, 3, channels, channels), jnp.float32, -bound, bound)
    b1 = jax.random.uniform(ks[1], (channels,), jnp.float32, -bound, bound)
    w2 = jax.random.uniform(ks[2], (3, 3, channels, channels), jnp.float32, -bound, bound)
    b2 = jax.random.uniform(ks[3], (channels,), jnp.float32, -bound, bound)
    return dict(w1=w1, b1=b1, w2=w2, b2=b2,
                g1=jnp.ones((channels,), jnp.float32),
                bt1=jnp.zeros((channels,), jnp.float32),
                g2=jnp.ones((channels,), jnp.float32),
                bt2=jnp.zeros((channels,), jnp.float32))


def reference(x_nchw, p):
    x = jnp.transpose(x_nchw, (0, 2, 3, 1)).astype(jnp.float32)

    def conv(h, w, b):
        y = jax.lax.conv_general_dilated(
            h, w, (1, 1), 'SAME', dimension_numbers=('NHWC', 'HWIO', 'NHWC'))
        return y + b.reshape(1, 1, 1, -1)

    def bn(y, g, bt):
        mu = jnp.mean(y, axis=(0, 1, 2), keepdims=True)
        var = jnp.mean((y - mu) ** 2, axis=(0, 1, 2), keepdims=True)
        return (y - mu) * jax.lax.rsqrt(var + EPS) * g.reshape(1, 1, 1, -1) \
            + bt.reshape(1, 1, 1, -1)

    h = jnp.maximum(bn(conv(x, p['w1'], p['b1']), p['g1'], p['bt1']), 0.0)
    o = bn(conv(h, p['w2'], p['b2']), p['g2'], p['bt2']) + x
    return jnp.transpose(jnp.maximum(o, 0.0), (0, 3, 1, 2))


if __name__ == "__main__":
    key = jax.random.PRNGKey(0)
    kx, kp = jax.random.split(key)

    N, C, H, W = 2, 4, 16, 16
    x = jax.random.normal(kx, (N, C, H, W), jnp.float32)
    p = make_params(kp, C)

    out = residual_block(x, p['w1'], p['g1'], p['bt1'], p['w2'], p['g2'], p['bt2'])
    out = jax.block_until_ready(out)

    ref = reference(x, p)
    assert out.shape == (N, C, H, W)
    assert bool(jnp.all(jnp.isfinite(out)))
    assert bool(jnp.allclose(out, ref, atol=1e-3, rtol=1e-3)), "mismatch vs reference"

    print("KERNEL_OK")
</pallas_src>

<mosaic_0001>
module attributes {stable_mosaic.version = 11 : i64} {
  func.func @_conv_bn_stats_kernel(%arg0: i32, %arg1: memref<8x128xf32, #tpu.memory_space<vmem>>, %arg2: memref<384x128xf32, #tpu.memory_space<vmem>>, %arg3: memref<8x128xf32, #tpu.memory_space<vmem>>, %arg4: memref<1x2x128xf32, #tpu.memory_space<vmem>>) attributes {dimension_semantics = [#tpu.dimension_semantics<parallel>], iteration_bounds = array<i64: 2>, scalar_prefetch = 0 : i64, scratch_operands = 0 : i64, tpu.core_type = #tpu.core_type<tc>, window_params = [{transform_indices = @transform_0, window_bounds = array<i64: 8, 128>}, {pipeline_mode = #tpu.pipeline_mode<synchronous>, transform_indices = @transform_1, window_bounds = array<i64: 384, 128>}, {transform_indices = @transform_2, window_bounds = array<i64: 8, 128>}, {transform_indices = @transform_3, window_bounds = array<i64: 1, 2, 128>}]} {
    %c0 = arith.constant 0 : index
    %c0_0 = arith.constant 0 : index
    %0 = vector.load %arg1[%c0, %c0_0] : memref<8x128xf32, #tpu.memory_space<vmem>>, vector<8x128xf32>
    %1 = tpu.iota {dimensions = array<i32: 0>} : vector<8x1xi32>
    %c8_i32 = arith.constant 8 : i32
    %c0_i32 = arith.constant 0 : i32
    %2 = arith.cmpi eq, %c8_i32, %c0_i32 : i32
    %c1_i32 = arith.constant 1 : i32
    %3 = arith.select %2, %c1_i32, %c8_i32 : i32
    %4 = vector.broadcast %3 : i32 to vector<8x1xi32>
    %5 = arith.remsi %1, %4 : vector<8x1xi32>
    %c0_i32_1 = arith.constant 0 : i32
    %6 = vector.broadcast %c0_i32_1 : i32 to vector<8x1xi32>
    %7 = arith.cmpi ne, %5, %6 : vector<8x1xi32>
    %c0_i32_2 = arith.constant 0 : i32
    %8 = vector.broadcast %c0_i32_2 : i32 to vector<8x1xi32>
    %9 = arith.cmpi slt, %5, %8 : vector<8x1xi32>
    %c0_i32_3 = arith.constant 0 : i32
    %10 = arith.cmpi slt, %3, %c0_i32_3 : i32
    %11 = vector.broadcast %10 : i1 to vector<8x1xi1>
    %12 = vector.broadcast %11 : vector<8x1xi1> to vector<8x1xi1>
    %13 = arith.xori %9, %12 : vector<8x1xi1>
    %14 = arith.andi %13, %7 : vector<8x1xi1>
    %15 = vector.broadcast %3 : i32 to vector<8x1xi32>
    %16 = arith.addi %5, %15 : vector<8x1xi32>
    %17 = arith.select %14, %16, %5 : vector<8x1xi1>, vector<8x1xi32>
    %c0_i32_4 = arith.constant 0 : i32
    %18 = vector.broadcast %c0_i32_4 : i32 to vector<8x1xi32>
    %19 = arith.cmpi eq, %17, %18 : vector<8x1xi32>
    %c1_i32_5 = arith.constant 1 : i32
    %20 = tpu.dynamic_rotate %0 by %c1_i32_5 dim 0 : vector<8x128xf32>, i32 -> vector<8x128xf32>
    %cst = arith.constant 0.000000e+00 : f32
    %21 = vector.shape_cast %19 : vector<8x1xi1> to vector<8x1xi1>
    %22 = vector.broadcast %21 : vector<8x1xi1> to vector<8x128xi1>
    %23 = vector.broadcast %cst : f32 to vector<8x128xf32>
    %24 = arith.select %22, %23, %20 : vector<8x128xi1>, vector<8x128xf32>
    %c8_i32_6 = arith.constant 8 : i32
    %c0_i32_7 = arith.constant 0 : i32
    %25 = arith.cmpi eq, %c8_i32_6, %c0_i32_7 : i32
    %c1_i32_8 = arith.constant 1 : i32
    %26 = arith.select %25, %c1_i32_8, %c8_i32_6 : i32
    %27 = vector.broadcast %26 : i32 to vector<8x1xi32>
    %28 = arith.remsi %1, %27 : vector<8x1xi32>
    %c0_i32_9 = arith.constant 0 : i32
    %29 = vector.broadcast %c0_i32_9 : i32 to vector<8x1xi32>
    %30 = arith.cmpi ne, %28, %29 : vector<8x1xi32>
    %c0_i32_10 = arith.constant 0 : i32
    %31 = vector.broadcast %c0_i32_10 : i32 to vector<8x1xi32>
    %32 = arith.cmpi slt, %28, %31 : vector<8x1xi32>
    %c0_i32_11 = arith.constant 0 : i32
    %33 = arith.cmpi slt, %26, %c0_i32_11 : i32
    %34 = vector.broadcast %33 : i1 to vector<8x1xi1>
    %35 = vector.broadcast %34 : vector<8x1xi1> to vector<8x1xi1>
    %36 = arith.xori %32, %35 : vector<8x1xi1>
    %37 = arith.andi %36, %30 : vector<8x1xi1>
    %38 = vector.broadcast %26 : i32 to vector<8x1xi32>
    %39 = arith.addi %28, %38 : vector<8x1xi32>
    %40 = arith.select %37, %39, %28 : vector<8x1xi1>, vector<8x1xi32>
    %c7_i32 = arith.constant 7 : i32
    %41 = vector.broadcast %c7_i32 : i32 to vector<8x1xi32>
    %42 = arith.cmpi eq, %40, %41 : vector<8x1xi32>
    %c7_i32_12 = arith.constant 7 : i32
    %43 = tpu.dynamic_rotate %0 by %c7_i32_12 dim 0 : vector<8x128xf32>, i32 -> vector<8x128xf32>
    %cst_13 = arith.constant 0.000000e+00 : f32
    %44 = vector.shape_cast %42 : vector<8x1xi1> to vector<8x1xi1>
    %45 = vector.broadcast %44 : vector<8x1xi1> to vector<8x128xi1>
    %46 = vector.broadcast %cst_13 : f32 to vector<8x128xf32>
    %47 = arith.select %45, %46, %43 : vector<8x128xi1>, vector<8x128xf32>
    %48 = tpu.concatenate %24, %0, %47 in 1 : vector<8x128xf32>, vector<8x128xf32>, vector<8x128xf32> -> vector<8x384xf32>
    %c0_14 = arith.constant 0 : index
    %c0_15 = arith.constant 0 : index
    %49 = vector.load %arg2[%c0_14, %c0_15] : memref<384x128xf32, #tpu.memory_space<vmem>>, vector<384x128xf32>
    %cst_16 = arith.constant dense<0.000000e+00> : vector<8x128xf32>
    %50 = tpu.matmul %48, %49, %cst_16 {dimension_numbers = #tpu.dot_dimension_numbers<[1], [0], [0], [1], [0, 0, 1, 1], [], []>} : vector<8x384xf32>, vector<384x128xf32>, vector<8x128xf32> -> vector<8x128xf32>
    %c0_17 = arith.constant 0 : index
    %c0_18 = arith.constant 0 : index
    %51 = vector.load %arg3[%c0_17, %c0_18] : memref<8x128xf32, #tpu.memory_space<vmem>>, vector<8x128xf32>
    tpu.vector_store %arg3[%c0_17, %c0_18], %50 {strides = array<i32>} : memref<8x128xf32, #tpu.memory_space<vmem>>, vector<8x128xf32>,
    %cst_19 = arith.constant dense<0.000000e+00> : vector<128xf32>
    %52 = vector.multi_reduction <add>, %50, %cst_19 [0] : vector<8x128xf32> to vector<128xf32>
    %53 = vector.shape_cast %52 : vector<128xf32> to vector<1x128xf32>
    %54 = arith.mulf %50, %50 : vector<8x128xf32>
    %cst_20 = arith.constant dense<0.000000e+00> : vector<128xf32>
    %55 = vector.multi_reduction <add>, %54, %cst_20 [0] : vector<8x128xf32> to vector<128xf32>
    %56 = vector.shape_cast %55 : vector<128xf32> to vector<1x128xf32>
    %57 = tpu.concatenate %53, %56 in 0 : vector<1x128xf32>, vector<1x128xf32> -> vector<2x128xf32>
    %c0_21 = arith.constant 0 : index
    %c0_22 = arith.constant 0 : index
    %c0_23 = arith.constant 0 : index
    %58 = vector.load %arg4[%c0_21, %c0_22, %c0_23] : memref<1x2x128xf32, #tpu.memory_space<vmem>>, vector<1x2x128xf32>
    %59 = vector.shape_cast %58 : vector<1x2x128xf32> to vector<2x128xf32>
    %60 = vector.shape_cast %57 : vector<2x128xf32> to vector<1x2x128xf32>
    tpu.vector_store %arg4[%c0_21, %c0_22, %c0_23], %60 {strides = array<i32>} : memref<1x2x128xf32, #tpu.memory_space<vmem>>, vector<1x2x128xf32>,
    return
  }
  func.func @transform_0(%arg0: i32) -> (i32, i32) {
    %c0_i32 = arith.constant 0 : i32
    %c0_i32_0 = arith.constant 0 : i32
    return %arg0, %c0_i32 : i32, i32
  }
  func.func @transform_1(%arg0: i32) -> (i32, i32) {
    %c0_i32 = arith.constant 0 : i32
    %c0_i32_0 = arith.constant 0 : i32
    %c0_i32_1 = arith.constant 0 : i32
    return %c0_i32, %c0_i32_0 : i32, i32
  }
  func.func @transform_2(%arg0: i32) -> (i32, i32) {
    %c0_i32 = arith.constant 0 : i32
    %c0_i32_0 = arith.constant 0 : i32
    return %arg0, %c0_i32 : i32, i32
  }
  func.func @transform_3(%arg0: i32) -> (i32, i32, i32) {
    %c0_i32 = arith.constant 0 : i32
    %c0_i32_0 = arith.constant 0 : i32
    %c0_i32_1 = arith.constant 0 : i32
    return %arg0, %c0_i32, %c0_i32_0 : i32, i32, i32
  }
}

module attributes {stable_mosaic.version = 11 : i64} {
  func.func @_conv_bn_stats_kernel(%arg0: i32, %arg1: memref<8x128xf32, #tpu.memory_space<vmem>>, %arg2: memref<384x128xf32, #tpu.memory_space<vmem>>, %arg3: memref<1x128xf32, #tpu.memory_space<vmem>>, %arg4: memref<1x128xf32, #tpu.memory_space<vmem>>, %arg5: memref<8x128xf32, #tpu.memory_space<vmem>>, %arg6: memref<1x2x128xf32, #tpu.memory_space<vmem>>) attributes {dimension_semantics = [#tpu.dimension_semantics<parallel>], iteration_bounds = array<i64: 2>, scalar_prefetch = 0 : i64, scratch_operands = 0 : i64, tpu.core_type = #tpu.core_type<tc>, window_params = [{transform_indices = @transform_0, window_bounds = array<i64: 8, 128>}, {pipeline_mode = #tpu.pipeline_mode<synchronous>, transform_indices = @transform_1, window_bounds = array<i64: 384, 128>}, {pipeline_mode = #tpu.pipeline_mode<synchronous>, transform_indices = @transform_2, window_bounds = array<i64: 1, 128>}, {pipeline_mode = #tpu.pipeline_mode<synchronous>, transform_indices = @transform_3, window_bounds = array<i64: 1, 128>}, {transform_indices = @transform_4, window_bounds = array<i64: 8, 128>}, {transform_indices = @transform_5, window_bounds = array<i64: 1, 2, 128>}]} {
    %c0 = arith.constant 0 : index
    %c0_0 = arith.constant 0 : index
    %0 = vector.load %arg1[%c0, %c0_0] : memref<8x128xf32, #tpu.memory_space<vmem>>, vector<8x128xf32>
    %c0_1 = arith.constant 0 : index
    %c0_2 = arith.constant 0 : index
    %1 = vector.load %arg3[%c0_1, %c0_2] : memref<1x128xf32, #tpu.memory_space<vmem>>, vector<1x128xf32>
    %2 = vector.broadcast %1 : vector<1x128xf32> to vector<8x128xf32>
    %3 = arith.mulf %0, %2 : vector<8x128xf32>
    %c0_3 = arith.constant 0 : index
    %c0_4 = arith.constant 0 : index
    %4 = vector.load %arg4[%c0_3, %c0_4] : memref<1x128xf32, #tpu.memory_space<vmem>>, vector<1x128xf32>
    %5 = vector.broadcast %4 : vector<1x128xf32> to vector<8x128xf32>
    %6 = arith.addf %3, %5 : vector<8x128xf32>
    %cst = arith.constant 0.000000e+00 : f32
    %7 = vector.broadcast %cst : f32 to vector<8x128xf32>
    %8 = arith.maximumf %6, %7 : vector<8x128xf32>
    %9 = tpu.iota {dimensions = array<i32: 0>} : vector<8x1xi32>
    %c8_i32 = arith.constant 8 : i32
    %c0_i32 = arith.constant 0 : i32
    %10 = arith.cmpi eq, %c8_i32, %c0_i32 : i32
    %c1_i32 = arith.constant 1 : i32
    %11 = arith.select %10, %c1_i32, %c8_i32 : i32
    %12 = vector.broadcast %11 : i32 to vector<8x1xi32>
    %13 = arith.remsi %9, %12 : vector<8x1xi32>
    %c0_i32_5 = arith.constant 0 : i32
    %14 = vector.broadcast %c0_i32_5 : i32 to vector<8x1xi32>
    %15 = arith.cmpi ne, %13, %14 : vector<8x1xi32>
    %c0_i32_6 = arith.constant 0 : i32
    %16 = vector.broadcast %c0_i32_6 : i32 to vector<8x1xi32>
    %17 = arith.cmpi slt, %13, %16 : vector<8x1xi32>
    %c0_i32_7 = arith.constant 0 : i32
    %18 = arith.cmpi slt, %11, %c0_i32_7 : i32
    %19 = vector.broadcast %18 : i1 to vector<8x1xi1>
    %20 = vector.broadcast %19 : vector<8x1xi1> to vector<8x1xi1>
    %21 = arith.xori %17, %20 : vector<8x1xi1>
    %22 = arith.andi %21, %15 : vector<8x1xi1>
    %23 = vector.broadcast %11 : i32 to vector<8x1xi32>
    %24 = arith.addi %13, %23 : vector<8x1xi32>
    %25 = arith.select %22, %24, %13 : vector<8x1xi1>, vector<8x1xi32>
    %c0_i32_8 = arith.constant 0 : i32
    %26 = vector.broadcast %c0_i32_8 : i32 to vector<8x1xi32>
    %27 = arith.cmpi eq, %25, %26 : vector<8x1xi32>
    %c1_i32_9 = arith.constant 1 : i32
    %28 = tpu.dynamic_rotate %8 by %c1_i32_9 dim 0 : vector<8x128xf32>, i32 -> vector<8x128xf32>
    %cst_10 = arith.constant 0.000000e+00 : f32
    %29 = vector.shape_cast %27 : vector<8x1xi1> to vector<8x1xi1>
    %30 = vector.broadcast %29 : vector<8x1xi1> to vector<8x128xi1>
    %31 = vector.broadcast %cst_10 : f32 to vector<8x128xf32>
    %32 = arith.select %30, %31, %28 : vector<8x128xi1>, vector<8x128xf32>
    %c8_i32_11 = arith.constant 8 : i32
    %c0_i32_12 = arith.constant 0 : i32
    %33 = arith.cmpi eq, %c8_i32_11, %c0_i32_12 : i32
    %c1_i32_13 = arith.constant 1 : i32
    %34 = arith.select %33, %c1_i32_13, %c8_i32_11 : i32
    %35 = vector.broadcast %34 : i32 to vector<8x1xi32>
    %36 = arith.remsi %9, %35 : vector<8x1xi32>
    %c0_i32_14 = arith.constant 0 : i32
    %37 = vector.broadcast %c0_i32_14 : i32 to vector<8x1xi32>
    %38 = arith.cmpi ne, %36, %37 : vector<8x1xi32>
    %c0_i32_15 = arith.constant 0 : i32
    %39 = vector.broadcast %c0_i32_15 : i32 to vector<8x1xi32>
    %40 = arith.cmpi slt, %36, %39 : vector<8x1xi32>
    %c0_i32_16 = arith.constant 0 : i32
    %41 = arith.cmpi slt, %34, %c0_i32_16 : i32
    %42 = vector.broadcast %41 : i1 to vector<8x1xi1>
    %43 = vector.broadcast %42 : vector<8x1xi1> to vector<8x1xi1>
    %44 = arith.xori %40, %43 : vector<8x1xi1>
    %45 = arith.andi %44, %38 : vector<8x1xi1>
    %46 = vector.broadcast %34 : i32 to vector<8x1xi32>
    %47 = arith.addi %36, %46 : vector<8x1xi32>
    %48 = arith.select %45, %47, %36 : vector<8x1xi1>, vector<8x1xi32>
    %c7_i32 = arith.constant 7 : i32
    %49 = vector.broadcast %c7_i32 : i32 to vector<8x1xi32>
    %50 = arith.cmpi eq, %48, %49 : vector<8x1xi32>
    %c7_i32_17 = arith.constant 7 : i32
    %51 = tpu.dynamic_rotate %8 by %c7_i32_17 dim 0 : vector<8x128xf32>, i32 -> vector<8x128xf32>
    %cst_18 = arith.constant 0.000000e+00 : f32
    %52 = vector.shape_cast %50 : vector<8x1xi1> to vector<8x1xi1>
    %53 = vector.broadcast %52 : vector<8x1xi1> to vector<8x128xi1>
    %54 = vector.broadcast %cst_18 : f32 to vector<8x128xf32>
    %55 = arith.select %53, %54, %51 : vector<8x128xi1>, vector<8x128xf32>
    %56 = tpu.concatenate %32, %8, %55 in 1 : vector<8x128xf32>, vector<8x128xf32>, vector<8x128xf32> -> vector<8x384xf32>
    %c0_19 = arith.constant 0 : index
    %c0_20 = arith.constant 0 : index
    %57 = vector.load %arg2[%c0_19, %c0_20] : memref<384x128xf32, #tpu.memory_space<vmem>>, vector<384x128xf32>
    %cst_21 = arith.constant dense<0.000000e+00> : vector<8x128xf32>
    %58 = tpu.matmul %56, %57, %cst_21 {dimension_numbers = #tpu.dot_dimension_numbers<[1], [0], [0], [1], [0, 0, 1, 1], [], []>} : vector<8x384xf32>, vector<384x128xf32>, vector<8x128xf32> -> vector<8x128xf32>
    %c0_22 = arith.constant 0 : index
    %c0_23 = arith.constant 0 : index
    %59 = vector.load %arg5[%c0_22, %c0_23] : memref<8x128xf32, #tpu.memory_space<vmem>>, vector<8x128xf32>
    tpu.vector_store %arg5[%c0_22, %c0_23], %58 {strides = array<i32>} : memref<8x128xf32, #tpu.memory_space<vmem>>, vector<8x128xf32>,
    %cst_24 = arith.constant dense<0.000000e+00> : vector<128xf32>
    %60 = vector.multi_reduction <add>, %58, %cst_24 [0] : vector<8x128xf32> to vector<128xf32>
    %61 = vector.shape_cast %60 : vector<128xf32> to vector<1x128xf32>
    %62 = arith.mulf %58, %58 : vector<8x128xf32>
    %cst_25 = arith.constant dense<0.000000e+00> : vector<128xf32>
    %63 = vector.multi_reduction <add>, %62, %cst_25 [0] : vector<8x128xf32> to vector<128xf32>
    %64 = vector.shape_cast %63 : vector<128xf32> to vector<1x128xf32>
    %65 = tpu.concatenate %61, %64 in 0 : vector<1x128xf32>, vector<1x128xf32> -> vector<2x128xf32>
    %c0_26 = arith.constant 0 : index
    %c0_27 = arith.constant 0 : index
    %c0_28 = arith.constant 0 : index
    %66 = vector.load %arg6[%c0_26, %c0_27, %c0_28] : memref<1x2x128xf32, #tpu.memory_space<vmem>>, vector<1x2x128xf32>
    %67 = vector.shape_cast %66 : vector<1x2x128xf32> to vector<2x128xf32>
    %68 = vector.shape_cast %65 : vector<2x128xf32> to vector<1x2x128xf32>
    tpu.vector_store %arg6[%c0_26, %c0_27, %c0_28], %68 {strides = array<i32>} : memref<1x2x128xf32, #tpu.memory_space<vmem>>, vector<1x2x128xf32>,
    return
  }
  func.func @transform_0(%arg0: i32) -> (i32, i32) {
    %c0_i32 = arith.constant 0 : i32
    %c0_i32_0 = arith.constant 0 : i32
    return %arg0, %c0_i32 : i32, i32
  }
  func.func @transform_1(%arg0: i32) -> (i32, i32) {
    %c0_i32 = arith.constant 0 : i32
    %c0_i32_0 = arith.constant 0 : i32
    %c0_i32_1 = arith.constant 0 : i32
    return %c0_i32, %c0_i32_0 : i32, i32
  }
  func.func @transform_2(%arg0: i32) -> (i32, i32) {
    %c0_i32 = arith.constant 0 : i32
    %c0_i32_0 = arith.constant 0 : i32
    %c0_i32_1 = arith.constant 0 : i32
    return %c0_i32, %c0_i32_0 : i32, i32
  }
  func.func @transform_3(%arg0: i32) -> (i32, i32) {
    %c0_i32 = arith.constant 0 : i32
    %c0_i32_0 = arith.constant 0 : i32
    %c0_i32_1 = arith.constant 0 : i32
    return %c0_i32, %c0_i32_0 : i32, i32
  }
  func.func @transform_4(%arg0: i32) -> (i32, i32) {
    %c0_i32 = arith.constant 0 : i32
    %c0_i32_0 = arith.constant 0 : i32
    return %arg0, %c0_i32 : i32, i32
  }
  func.func @transform_5(%arg0: i32) -> (i32, i32, i32) {
    %c0_i32 = arith.constant 0 : i32
    %c0_i32_0 = arith.constant 0 : i32
    %c0_i32_1 = arith.constant 0 : i32
    return %arg0, %c0_i32, %c0_i32_0 : i32, i32, i32
  }
}

</mosaic_0001>

<bundles_post_ra>
// kernel: squeeze.40
= control target key start
LH: loop header
LB: loop body
LE: loop exit
PB: predicated region body
PF: predicated region fallthrough
CT: control target
= control target key end

     0   :  { %s259_s8 = smov 116   ;;  %s260_s9 = smov 120   ;;  %vm8_vm0 = vcmask 31744   ;;  %s430_s0 = inlined_call_operand.vmem [shape: f32[128], index: 0, kind: input, shape index: {}]   ;;  %s431_s1 = inlined_call_operand.vmem [shape: f32[32,4], index: 1, kind: output, shape index: {}]  }
   0x1   :  { %v5_v0 = vld [vmem:[%s430_s0] sm:$0x1]  ;;  %s258_s0 = smov 124   ;;  %s261_s10 = smov 112  }
   0x2   :  { %6 = vst [vmem:[#allocation0] sm:$0x1] %v5_v0  ;;  %s262_s11 = smov 108   ;;  %s263_s12 = smov 104  }
   0x3   :  { %s264_s13 = smov 100   ;;  %s265_s14 = smov 96  }
   0x4   :  { %s266_s15 = smov 92   ;;  %s267_s16 = smov 88  }
   0x5   :  { %s268_s17 = smov 84   ;;  %s269_s18 = smov 80  }
   0x6   :  { %s270_s19 = smov 76   ;;  %s271_s20 = smov 72  }
   0x7   :  { %s272_s21 = smov 68   ;;  %s273_s22 = smov 64  }
   0x8   :  { %s274_s23 = smov 60   ;;  %s275_s24 = smov 56  }
   0x9   :  { %v10_v1 = vld [vmem:[#allocation0] sm:$0x1]   ;;  %s276_s25 = smov 52   ;;  %s277_s26 = smov 48  }
   0xa   :  { %v22_v2 = vld [vmem:[#allocation0] sm:$0x1]   ;;  %11 = vrot.lane.b32.xlu0 %v10_v1, %s258_s0  ;;  %s278_s27 = smov 44   ;;  %s279_s28 = smov 40  }
   0xb   :  { %23 = vrot.lane.b32.xlu1 %v22_v2, %s259_s8  ;;  %v16_v3 = vld [vmem:[#allocation0] sm:$0x1]   ;;  %s280_s29 = smov 36   ;;  %s281_s30 = smov 32  }
   0xc   :  { %v28_v4 = vld [vmem:[#allocation0] sm:$0x1]   ;;  %s282_s4 = smov 28   ;;  %s283_s5 = smov 24  }
   0xd   :  { %v34_v5 = vld [vmem:[#allocation0] sm:$0x1]   ;;  %s284_s6 = smov 20   ;;  %s285_s7 = smov 16  }
   0xe   :  { %17 = vrot.lane.b32.xlu0 %v16_v3, %s260_s9  ;;  %v40_v6 = vld [vmem:[#allocation0] sm:$0x1]   ;;  %s286_s0 = smov 12   ;;  %s287_s8 = smov 8  }
   0xf   :  { %29 = vrot.lane.b32.xlu1 %v28_v4, %s261_s10  ;;  %v46_v7 = vld [vmem:[#allocation0] sm:$0x1]   ;;  %s288_s9 = smov 4  }
  0x10   :  { %v52_v8 = vld [vmem:[#allocation0] sm:$0x1]  }
  0x11   :  { %v58_v9 = vld [vmem:[#allocation0] sm:$0x1]  }
  0x12   :  { %35 = vrot.lane.b32.xlu0 %v34_v5, %s262_s11  ;;  %v64_v10 = vld [vmem:[#allocation0] sm:$0x1]  }
  0x13   :  { %41 = vrot.lane.b32.xlu1 %v40_v6, %s263_s12  ;;  %v70_v11 = vld [vmem:[#allocation0] sm:$0x1]  }
  0x14   :  { %v76_v12 = vld [vmem:[#allocation0] sm:$0x1]  }
  0x15   :  { %v82_v13 = vld [vmem:[#allocation0] sm:$0x1]  }
  0x16   :  { %47 = vrot.lane.b32.xlu0 %v46_v7, %s264_s13  ;;  %v88_v14 = vld [vmem:[#allocation0] sm:$0x1]  }
  0x17   :  { %53 = vrot.lane.b32.xlu1 %v52_v8, %s265_s14  ;;  %v94_v15 = vld [vmem:[#allocation0] sm:$0x1]  }
  0x18   :  { %v100_v16 = vld [vmem:[#allocation0] sm:$0x1]  }
  0x19   :  { %v106_v17 = vld [vmem:[#allocation0] sm:$0x1]  }
  0x1a   :  { %59 = vrot.lane.b32.xlu0 %v58_v9, %s266_s15  ;;  %v112_v18 = vld [vmem:[#allocation0] sm:$0x1]  }
  0x1b   :  { %65 = vrot.lane.b32.xlu1 %v64_v10, %s267_s16  ;;  %v118_v19 = vld [vmem:[#allocation0] sm:$0x1]  }
  0x1c   :  { %v124_v20 = vld [vmem:[#allocation0] sm:$0x1]  }
  0x1d   :  { %v130_v21 = vld [vmem:[#allocation0] sm:$0x1]  }
  0x1e   :  { %71 = vrot.lane.b32.xlu0 %v70_v11, %s268_s17  ;;  %v136_v22 = vld [vmem:[#allocation0] sm:$0x1]  }
  0x1f   :  { %77 = vrot.lane.b32.xlu1 %v76_v12, %s269_s18  ;;  %v142_v23 = vld [vmem:[#allocation0] sm:$0x1]  }
  0x20   :  { %v148_v24 = vld [vmem:[#allocation0] sm:$0x1]  }
  0x21   :  { %v154_v25 = vld [vmem:[#allocation0] sm:$0x1]  }
  0x22   :  { %83 = vrot.lane.b32.xlu0 %v82_v13, %s270_s19  ;;  %v160_v26 = vld [vmem:[#allocation0] sm:$0x1]  }
  0x23   :  { %89 = vrot.lane.b32.xlu1 %v88_v14, %s271_s20  ;;  %v7_v27 = vld [vmem:[#allocation0] sm:$0x1]  }
  0x24   :  { %9 = vst.msk [vmem:[%s431_s1] sm:$0x1] %vm8_vm0, %v7_v27   ;;  %v166_v28 = vld [vmem:[#allocation0] sm:$0x1]  }
  0x25   :  { %v172_v29 = vld [vmem:[#allocation0] sm:$0x1]  }
  0x26   :  { %95 = vrot.lane.b32.xlu0 %v94_v15, %s272_s21  ;;  %v178_v30 = vld [vmem:[#allocation0] sm:$0x1]  }
  0x27   :  { %101 = vrot.lane.b32.xlu1 %v100_v16, %s273_s22  ;;  %v184_v31 = vld [vmem:[#allocation0] sm:$0x1]  }
  0x28   :  { %v190_v32 = vld [vmem:[#allocation0] sm:$0x1]  }
  0x2a   :  { %107 = vrot.lane.b32.xlu0 %v106_v17, %s274_s23 }
  0x2b   :  { %113 = vrot.lane.b32.xlu1 %v112_v18, %s275_s24 }
  0x2e   :  { %119 = vrot.lane.b32.xlu0 %v118_v19, %s276_s25 }
  0x2f   :  { %125 = vrot.lane.b32.xlu1 %v124_v20, %s277_s26 }
  0x32   :  { %131 = vrot.lane.b32.xlu0 %v130_v21, %s278_s27 }
  0x33   :  { %137 = vrot.lane.b32.xlu1 %v136_v22, %s279_s28 }
  0x36   :  { %143 = vrot.lane.b32.xlu0 %v142_v23, %s280_s29 }
  0x37   :  { %149 = vrot.lane.b32.xlu1 %v148_v24, %s281_s30 }
  0x3a   :  { %155 = vrot.lane.b32.xlu0 %v154_v25, %s282_s4 }
  0x3b   :  { %161 = vrot.lane.b32.xlu1 %v160_v26, %s283_s5 }
  0x3e   :  { %167 = vrot.lane.b32.xlu0 %v166_v28, %s284_s6 }
  0x3f   :  { %173 = vrot.lane.b32.xlu1 %v172_v29, %s285_s7 }
  0x42   :  { %179 = vrot.lane.b32.xlu0 %v178_v30, %s286_s0 }
  0x43   :  { %185 = vrot.lane.b32.xlu1 %v184_v31, %s287_s8 }
  0x46   :  { %191 = vrot.lane.b32.xlu0 %v190_v32, %s288_s9 }
  0x7c   :  { %v12_v33 = vpop.permute.xlu0 %11  }
  0x7d   :  { %v24_v34 = vpop.permute.xlu1 %23   ;;  %196 = vst.msk [vmem:[%s431_s1 + $0x1] sm:$0x1] %vm8_vm0, %v12_v33  }
  0x7e   :  { %198 = vst.msk [vmem:[%s431_s1 + $0x3] sm:$0x1] %vm8_vm0, %v24_v34  }
  0x80   :  { %v18_v35 = vpop.permute.xlu0 %17  }
  0x81   :  { %v30_v36 = vpop.permute.xlu1 %29   ;;  %197 = vst.msk [vmem:[%s431_s1 + $0x2] sm:$0x1] %vm8_vm0, %v18_v35  }
  0x82   :  { %199 = vst.msk [vmem:[%s431_s1 + $0x4] sm:$0x1] %vm8_vm0, %v30_v36  }
  0x84   :  { %v36_v37 = vpop.permute.xlu0 %35  }
  0x85   :  { %v42_v38 = vpop.permute.xlu1 %41   ;;  %200 = vst.msk [vmem:[%s431_s1 + $0x5] sm:$0x1] %vm8_vm0, %v36_v37  }
  0x86   :  { %201 = vst.msk [vmem:[%s431_s1 + $0x6] sm:$0x1] %vm8_vm0, %v42_v38  }
  0x88   :  { %v48_v39 = vpop.permute.xlu0 %47  }
  0x89   :  { %v54_v40 = vpop.permute.xlu1 %53   ;;  %202 = vst.msk [vmem:[%s431_s1 + $0x7] sm:$0x1] %vm8_vm0, %v48_v39  }
  0x8a   :  { %203 = vst.msk [vmem:[%s431_s1 + $0x8] sm:$0x1] %vm8_vm0, %v54_v40  }
  0x8c   :  { %v60_v41 = vpop.permute.xlu0 %59  }
  0x8d   :  { %v66_v42 = vpop.permute.xlu1 %65   ;;  %204 = vst.msk [vmem:[%s431_s1 + $0x9] sm:$0x1] %vm8_vm0, %v60_v41  }
  0x8e   :  { %205 = vst.msk [vmem:[%s431_s1 + $0xa] sm:$0x1] %vm8_vm0, %v66_v42  }
  0x90   :  { %v72_v43 = vpop.permute.xlu0 %71  }
  0x91   :  { %v78_v44 = vpop.permute.xlu1 %77   ;;  %206 = vst.msk [vmem:[%s431_s1 + $0xb] sm:$0x1] %vm8_vm0, %v72_v43  }
  0x92   :  { %207 = vst.msk [vmem:[%s431_s1 + $0xc] sm:$0x1] %vm8_vm0, %v78_v44  }
  0x94   :  { %v84_v45 = vpop.permute.xlu0 %83  }
  0x95   :  { %v90_v46 = vpop.permute.xlu1 %89   ;;  %208 = vst.msk [vmem:[%s431_s1 + $0xd] sm:$0x1] %vm8_vm0, %v84_v45  }
  0x96   :  { %209 = vst.msk [vmem:[%s431_s1 + $0xe] sm:$0x1] %vm8_vm0, %v90_v46  }
  0x98   :  { %v96_v47 = vpop.permute.xlu0 %95  }
  0x99   :  { %v102_v48 = vpop.permute.xlu1 %101   ;;  %210 = vst.msk [vmem:[%s431_s1 + $0xf] sm:$0x1] %vm8_vm0, %v96_v47  }
  0x9a   :  { %211 = vst.msk [vmem:[%s431_s1 + $0x10] sm:$0x1] %vm8_vm0, %v102_v48  }
  0x9c   :  { %v108_v49 = vpop.permute.xlu0 %107  }
  0x9d   :  { %v114_v50 = vpop.permute.xlu1 %113   ;;  %212 = vst.msk [vmem:[%s431_s1 + $0x11] sm:$0x1] %vm8_vm0, %v108_v49  }
  0x9e   :  { %213 = vst.msk [vmem:[%s431_s1 + $0x12] sm:$0x1] %vm8_vm0, %v114_v50  }
  0xa0   :  { %v120_v51 = vpop.permute.xlu0 %119  }
  0xa1   :  { %v126_v52 = vpop.permute.xlu1 %125   ;;  %214 = vst.msk [vmem:[%s431_s1 + $0x13] sm:$0x1] %vm8_vm0, %v120_v51  }
  0xa2   :  { %215 = vst.msk [vmem:[%s431_s1 + $0x14] sm:$0x1] %vm8_vm0, %v126_v52  }
  0xa4   :  { %v132_v53 = vpop.permute.xlu0 %131  }
  0xa5   :  { %v138_v54 = vpop.permute.xlu1 %137   ;;  %216 = vst.msk [vmem:[%s431_s1 + $0x15] sm:$0x1] %vm8_vm0, %v132_v53  }
  0xa6   :  { %217 = vst.msk [vmem:[%s431_s1 + $0x16] sm:$0x1] %vm8_vm0, %v138_v54  }
  0xa8   :  { %v144_v55 = vpop.permute.xlu0 %143  }
  0xa9   :  { %v150_v56 = vpop.permute.xlu1 %149   ;;  %218 = vst.msk [vmem:[%s431_s1 + $0x17] sm:$0x1] %vm8_vm0, %v144_v55  }
  0xaa   :  { %219 = vst.msk [vmem:[%s431_s1 + $0x18] sm:$0x1] %vm8_vm0, %v150_v56  }
  0xac   :  { %v156_v57 = vpop.permute.xlu0 %155  }
  0xad   :  { %v162_v58 = vpop.permute.xlu1 %161   ;;  %220 = vst.msk [vmem:[%s431_s1 + $0x19] sm:$0x1] %vm8_vm0, %v156_v57  }
  0xae   :  { %221 = vst.msk [vmem:[%s431_s1 + $0x1a] sm:$0x1] %vm8_vm0, %v162_v58  }
  0xb0   :  { %v168_v59 = vpop.permute.xlu0 %167  }
  0xb1   :  { %v174_v60 = vpop.permute.xlu1 %173   ;;  %222 = vst.msk [vmem:[%s431_s1 + $0x1b] sm:$0x1] %vm8_vm0, %v168_v59  }
  0xb2   :  { %223 = vst.msk [vmem:[%s431_s1 + $0x1c] sm:$0x1] %vm8_vm0, %v174_v60  }
  0xb4   :  { %v180_v61 = vpop.permute.xlu0 %179  }
  0xb5   :  { %v186_v62 = vpop.permute.xlu1 %185   ;;  %224 = vst.msk [vmem:[%s431_s1 + $0x1d] sm:$0x1] %vm8_vm0, %v180_v61  }
  0xb6   :  { %225 = vst.msk [vmem:[%s431_s1 + $0x1e] sm:$0x1] %vm8_vm0, %v186_v62  }
  0xb8   :  { %v192_v63 = vpop.permute.xlu0 %191  }
  0xb9   :  { %226 = vst.msk [vmem:[%s431_s1 + $0x1f] sm:$0x1] %vm8_vm0, %v192_v63  }

// kernel: tile.23
= control target key start
LH: loop header
LB: loop body
LE: loop exit
PB: predicated region body
PF: predicated region fallthrough
CT: control target
= control target key end

     0   :  { %s40_s0 = inlined_call_operand.vmem [shape: f32[4], index: 0, kind: input, shape index: {}]   ;;  %s41_s1 = inlined_call_operand.vmem [shape: f32[32,4], index: 1, kind: output, shape index: {}]  }
   0x1   :  { %v4_v0 = vld [vmem:[%s40_s0] ss:$0 sm:$0xff] }
   0x2   :  { %5 = vst [vmem:[%s41_s1] sm:$0xff] %v4_v0  ;;  %12 = vst [vmem:[%s41_s1 + $0x8] sm:$0xff] %v4_v0 }
   0x3   :  { %13 = vst [vmem:[%s41_s1 + $0x10] sm:$0xff] %v4_v0  ;;  %14 = vst [vmem:[%s41_s1 + $0x18] sm:$0xff] %v4_v0 }

// kernel: tile.24
= control target key start
LH: loop header
LB: loop body
LE: loop exit
PB: predicated region body
PF: predicated region fallthrough
CT: control target
= control target key end

     0   :  { %s261_s10 = smov 124   ;;  %s262_s11 = smov 116   ;;  %vm3_vm0 = vcmask 31744   ;;  %vm9_vm1 = vcmask 1048544   ;;  %vm15_vm2 = vcmask 1015744   ;;  %vm21_vm3 = vcmask 982944   ;;  %s401_s0 = inlined_call_operand.vmem [shape: f32[32,4], index: 0, kind: input, shape index: {}]   ;;  %s402_s1 = inlined_call_operand.vmem [shape: f32[1,128], index: 1, kind: output, shape index: {}]  }
   0x1   :  { %v199_v0 = vld [vmem:[%s401_s0 + $0x1f] sm:$0x1]   ;;  %v201_v1 = vld [vmem:[%s401_s0 + $0x1d] sm:$0x1]   ;;  %v200_v2 = vld [vmem:[%s401_s0 + $0x1e] sm:$0x1]  }
   0x2   :  { %7 = vrot.lane.b32.xlu0 %v199_v0, %s261_s10  ;;  %19 = vrot.lane.b32.xlu1 %v201_v1, %s262_s11  ;;  %v202_v3 = vld [vmem:[%s401_s0 + $0x1c] sm:$0x1]   ;;  %s263_s16 = smov 120   ;;  %s264_s17 = smov 112   ;;  %v203_v4 = vld [vmem:[%s401_s0 + $0x1b] sm:$0x1]  }
   0x3   :  { %v204_v5 = vld [vmem:[%s401_s0 + $0x1a] sm:$0x1]   ;;  %s265_s22 = smov 108   ;;  %s266_s23 = smov 104   ;;  %v205_v6 = vld [vmem:[%s401_s0 + $0x19] sm:$0x1]  }
   0x4   :  { %v206_v7 = vld [vmem:[%s401_s0 + $0x18] sm:$0x1]   ;;  %s267_s28 = smov 100   ;;  %s268_s29 = smov 96   ;;  %v207_v8 = vld [vmem:[%s401_s0 + $0x17] sm:$0x1]  }
   0x5   :  { %v208_v9 = vld [vmem:[%s401_s0 + $0x16] sm:$0x1]   ;;  %v2_v10 = vld [vmem:[%s401_s0] sm:$0x1]   ;;  %s269_s7 = smov 92   ;;  %s270_s8 = smov 88  }
   0x6   :  { %13 = vrot.lane.b32.xlu0 %v200_v2, %s263_s16  ;;  %25 = vrot.lane.b32.xlu1 %v202_v3, %s264_s17  ;;  %4 = vst.msk [vmem:[#allocation0] sm:$0x1] %vm3_vm0, %v2_v10   ;;  %v209_v11 = vld [vmem:[%s401_s0 + $0x15] sm:$0x1]   ;;  %v210_v12 = vld [vmem:[%s401_s0 + $0x14] sm:$0x1]  }
   0x7   :  { %s271_s13 = smov 84   ;;  %s272_s14 = smov 80   ;;  %v211_v13 = vld [vmem:[%s401_s0 + $0x13] sm:$0x1]   ;;  %v212_v14 = vld [vmem:[%s401_s0 + $0x12] sm:$0x1]  }
   0x8   :  { %s273_s19 = smov 76   ;;  %s274_s20 = smov 72   ;;  %v213_v15 = vld [vmem:[%s401_s0 + $0x11] sm:$0x1]   ;;  %v214_v16 = vld [vmem:[%s401_s0 + $0x10] sm:$0x1]  }
   0x9   :  { %s275_s25 = smov 68   ;;  %s276_s26 = smov 64   ;;  %v215_v17 = vld [vmem:[%s401_s0 + $0xf] sm:$0x1]   ;;  %v216_v18 = vld [vmem:[%s401_s0 + $0xe] sm:$0x1]  }
   0xa   :  { %31 = vrot.lane.b32.xlu0 %v203_v4, %s265_s22  ;;  %37 = vrot.lane.b32.xlu1 %v204_v5, %s266_s23  ;;  %s277_s2 = smov 60   ;;  %s278_s3 = smov 56   ;;  %v217_v19 = vld [vmem:[%s401_s0 + $0xd] sm:$0x1]   ;;  %v218_v20 = vld [vmem:[%s401_s0 + $0xc] sm:$0x1]  }
   0xb   :  { %s280_s9 = smov 48   ;;  %v219_v21 = vld [vmem:[%s401_s0 + $0xb] sm:$0x1]   ;;  %v220_v22 = vld [vmem:[%s401_s0 + $0xa] sm:$0x1]   ;;  %s282_s15 = smov 40  }
   0xc   :  { %v221_v23 = vld [vmem:[%s401_s0 + $0x9] sm:$0x1]   ;;  %v222_v24 = vld [vmem:[%s401_s0 + $0x8] sm:$0x1]   ;;  %s284_s21 = smov 32   ;;  %s286_s27 = smov 24  }
   0xd   :  { %v223_v25 = vld [vmem:[%s401_s0 + $0x7] sm:$0x1]   ;;  %v224_v26 = vld [vmem:[%s401_s0 + $0x6] sm:$0x1]   ;;  %v225_v27 = vld [vmem:[%s401_s0 + $0x5] sm:$0x1]  }
   0xe   :  { %43 = vrot.lane.b32.xlu0 %v205_v6, %s267_s28  ;;  %49 = vrot.lane.b32.xlu1 %v206_v7, %s268_s29  ;;  %v226_v28 = vld [vmem:[%s401_s0 + $0x4] sm:$0x1]   ;;  %s288_s4 = smov 16   ;;  %v227_v29 = vld [vmem:[%s401_s0 + $0x3] sm:$0x1]   ;;  %s290_s10 = smov 8  }
   0xf   :  { %v228_v30 = vld [vmem:[%s401_s0 + $0x2] sm:$0x1]   ;;  %v229_v31 = vld [vmem:[%s401_s0 + $0x1] sm:$0x1]   ;;  %s291_s0 = smov 4   ;;  %vm27_vm4 = vcmask 950144  }
  0x10   :  { %vm33_vm5 = vcmask 917344   ;;  %vm39_vm6 = vcmask 884544   ;;  %vm45_vm7 = vcmask 851744   ;;  %vm51_vm8 = vcmask 818944  }
  0x11   :  { %vm57_vm9 = vcmask 786144   ;;  %vm63_vm10 = vcmask 753344   ;;  %vm69_vm11 = vcmask 720544   ;;  %vm75_vm12 = vcmask 687744  }
  0x12   :  { %55 = vrot.lane.b32.xlu0 %v207_v8, %s269_s7  ;;  %61 = vrot.lane.b32.xlu1 %v208_v9, %s270_s8  ;;  %s279_s8 = smov 52   ;;  %vm81_vm13 = vcmask 654944   ;;  %vm87_vm14 = vcmask 622144   ;;  %vm93_vm15 = vcmask 589344   ;;  %vm99_vm0 = vcmask 556544  }
  0x16   :  { %67 = vrot.lane.b32.xlu0 %v209_v11, %s271_s13  ;;  %73 = vrot.lane.b32.xlu1 %v210_v12, %s272_s14  ;;  %s281_s14 = smov 44  }
  0x1a   :  { %79 = vrot.lane.b32.xlu0 %v211_v13, %s273_s19  ;;  %85 = vrot.lane.b32.xlu1 %v212_v14, %s274_s20  ;;  %s283_s20 = smov 36  }
  0x1e   :  { %91 = vrot.lane.b32.xlu0 %v213_v15, %s275_s25  ;;  %97 = vrot.lane.b32.xlu1 %v214_v16, %s276_s26  ;;  %s285_s26 = smov 28  }
  0x22   :  { %103 = vrot.lane.b32.xlu0 %v215_v17, %s277_s2  ;;  %109 = vrot.lane.b32.xlu1 %v216_v18, %s278_s3  ;;  %s287_s3 = smov 20  }
  0x26   :  { %115 = vrot.lane.b32.xlu0 %v217_v19, %s279_s8  ;;  %121 = vrot.lane.b32.xlu1 %v218_v20, %s280_s9  ;;  %s289_s9 = smov 12  }
  0x2a   :  { %127 = vrot.lane.b32.xlu0 %v219_v21, %s281_s14  ;;  %133 = vrot.lane.b32.xlu1 %v220_v22, %s282_s15 }
  0x2e   :  { %139 = vrot.lane.b32.xlu0 %v221_v23, %s283_s20  ;;  %145 = vrot.lane.b32.xlu1 %v222_v24, %s284_s21 }
  0x32   :  { %151 = vrot.lane.b32.xlu0 %v223_v25, %s285_s26  ;;  %157 = vrot.lane.b32.xlu1 %v224_v26, %s286_s27 }
  0x36   :  { %163 = vrot.lane.b32.xlu0 %v225_v27, %s287_s3  ;;  %169 = vrot.lane.b32.xlu1 %v226_v28, %s288_s4 }
  0x3a   :  { %175 = vrot.lane.b32.xlu0 %v227_v29, %s289_s9  ;;  %181 = vrot.lane.b32.xlu1 %v228_v30, %s290_s10 }
  0x3e   :  { %187 = vrot.lane.b32.xlu0 %v229_v31, %s291_s0 }
  0x74   :  { %v8_v32 = vpop.permute.xlu0 %7   ;;  %v20_v33 = vpop.permute.xlu1 %19  }
  0x75   :  { %10 = vst.msk [vmem:[#allocation0] sm:$0x1] %vm9_vm1, %v8_v32   ;;  %vm105_vm1 = vcmask 523744  }
  0x78   :  { %v14_v34 = vpop.permute.xlu0 %13   ;;  %v26_v35 = vpop.permute.xlu1 %25  }
  0x79   :  { %16 = vst.msk [vmem:[#allocation0] sm:$0x1] %vm15_vm2, %v14_v34   ;;  %vm111_vm2 = vcmask 490944  }
  0x7a   :  { %22 = vst.msk [vmem:[#allocation0] sm:$0x1] %vm21_vm3, %v20_v33   ;;  %vm117_vm3 = vcmask 458144  }
  0x7b   :  { %28 = vst.msk [vmem:[#allocation0] sm:$0x1] %vm27_vm4, %v26_v35   ;;  %vm123_vm4 = vcmask 425344  }
  0x7c   :  { %v32_v36 = vpop.permute.xlu0 %31   ;;  %v38_v37 = vpop.permute.xlu1 %37  }
  0x7d   :  { %34 = vst.msk [vmem:[#allocation0] sm:$0x1] %vm33_vm5, %v32_v36   ;;  %vm129_vm5 = vcmask 392544  }
  0x7e   :  { %40 = vst.msk [vmem:[#allocation0] sm:$0x1] %vm39_vm6, %v38_v37   ;;  %vm135_vm6 = vcmask 359744  }
  0x80   :  { %v44_v38 = vpop.permute.xlu0 %43   ;;  %v50_v39 = vpop.permute.xlu1 %49  }
  0x81   :  { %46 = vst.msk [vmem:[#allocation0] sm:$0x1] %vm45_vm7, %v44_v38   ;;  %vm141_vm7 = vcmask 326944  }
  0x82   :  { %52 = vst.msk [vmem:[#allocation0] sm:$0x1] %vm51_vm8, %v50_v39   ;;  %vm147_vm8 = vcmask 294144  }
  0x84   :  { %v56_v40 = vpop.permute.xlu0 %55   ;;  %v62_v41 = vpop.permute.xlu1 %61  }
  0x85   :  { %58 = vst.msk [vmem:[#allocation0] sm:$0x1] %vm57_vm9, %v56_v40   ;;  %vm153_vm9 = vcmask 261344  }
  0x86   :  { %64 = vst.msk [vmem:[#allocation0] sm:$0x1] %vm63_vm10, %v62_v41   ;;  %vm159_vm10 = vcmask 228544  }
  0x88   :  { %v68_v42 = vpop.permute.xlu0 %67   ;;  %v74_v43 = vpop.permute.xlu1 %73  }
  0x89   :  { %70 = vst.msk [vmem:[#allocation0] sm:$0x1] %vm69_vm11, %v68_v42   ;;  %vm165_vm11 = vcmask 195744  }
  0x8a   :  { %76 = vst.msk [vmem:[#allocation0] sm:$0x1] %vm75_vm12, %v74_v43   ;;  %vm171_vm12 = vcmask 162944  }
  0x8c   :  { %v80_v44 = vpop.permute.xlu0 %79   ;;  %v86_v45 = vpop.permute.xlu1 %85  }
  0x8d   :  { %82 = vst.msk [vmem:[#allocation0] sm:$0x1] %vm81_vm13, %v80_v44   ;;  %vm177_vm13 = vcmask 130144  }
  0x8e   :  { %88 = vst.msk [vmem:[#allocation0] sm:$0x1] %vm87_vm14, %v86_v45   ;;  %vm183_vm14 = vcmask 97344  }
  0x90   :  { %v92_v46 = vpop.permute.xlu0 %91   ;;  %v98_v47 = vpop.permute.xlu1 %97  }
  0x91   :  { %94 = vst.msk [vmem:[#allocation0] sm:$0x1] %vm93_vm15, %v92_v46   ;;  %vm189_vm15 = vcmask 64544  }
  0x92   :  { %100 = vst.msk [vmem:[#allocation0] sm:$0x1] %vm99_vm0, %v98_v47  }
  0x94   :  { %v104_v48 = vpop.permute.xlu0 %103   ;;  %v110_v49 = vpop.permute.xlu1 %109  }
  0x95   :  { %106 = vst.msk [vmem:[#allocation0] sm:$0x1] %vm105_vm1, %v104_v48  }
  0x96   :  { %112 = vst.msk [vmem:[#allocation0] sm:$0x1] %vm111_vm2, %v110_v49  }
  0x98   :  { %v116_v50 = vpop.permute.xlu0 %115   ;;  %v122_v51 = vpop.permute.xlu1 %121  }
  0x99   :  { %118 = vst.msk [vmem:[#allocation0] sm:$0x1] %vm117_vm3, %v116_v50  }
  0x9a   :  { %124 = vst.msk [vmem:[#allocation0] sm:$0x1] %vm123_vm4, %v122_v51  }
  0x9c   :  { %v128_v52 = vpop.permute.xlu0 %127   ;;  %v134_v53 = vpop.permute.xlu1 %133  }
  0x9d   :  { %130 = vst.msk [vmem:[#allocation0] sm:$0x1] %vm129_vm5, %v128_v52  }
  0x9e   :  { %136 = vst.msk [vmem:[#allocation0] sm:$0x1] %vm135_vm6, %v134_v53  }
  0xa0   :  { %v140_v54 = vpop.permute.xlu0 %139   ;;  %v146_v55 = vpop.permute.xlu1 %145  }
  0xa1   :  { %142 = vst.msk [vmem:[#allocation0] sm:$0x1] %vm141_vm7, %v140_v54  }
  0xa2   :  { %148 = vst.msk [vmem:[#allocation0] sm:$0x1] %vm147_vm8, %v146_v55  }
  0xa4   :  { %v152_v56 = vpop.permute.xlu0 %151   ;;  %v158_v57 = vpop.permute.xlu1 %157  }
  0xa5   :  { %154 = vst.msk [vmem:[#allocation0] sm:$0x1] %vm153_vm9, %v152_v56  }
  0xa6   :  { %160 = vst.msk [vmem:[#allocation0] sm:$0x1] %vm159_vm10, %v158_v57  }
  0xa8   :  { %v164_v58 = vpop.permute.xlu0 %163   ;;  %v170_v59 = vpop.permute.xlu1 %169  }
  0xa9   :  { %166 = vst.msk [vmem:[#allocation0] sm:$0x1] %vm165_vm11, %v164_v58  }
  0xaa   :  { %172 = vst.msk [vmem:[#allocation0] sm:$0x1] %vm171_vm12, %v170_v59  }
  0xac   :  { %v176_v60 = vpop.permute.xlu0 %175   ;;  %v182_v61 = vpop.permute.xlu1 %181  }
  0xad   :  { %178 = vst.msk [vmem:[#allocation0] sm:$0x1] %vm177_vm13, %v176_v60  }
  0xae   :  { %184 = vst.msk [vmem:[#allocation0] sm:$0x1] %vm183_vm14, %v182_v61  }
  0xb0   :  { %v188_v62 = vpop.permute.xlu0 %187  }
  0xb1   :  { %190 = vst.msk [vmem:[#allocation0] sm:$0x1] %vm189_vm15, %v188_v62  }
  0xb8   :  { %v195_v63 = vld [vmem:[#allocation0] sm:$0x1] }
  0xb9   :  { %198 = vst [vmem:[%s402_s1] sm:$0x1] %v195_v63 }

// kernel: residual_block.2
= control target key start
LH: loop header
LB: loop body
LE: loop exit
PB: predicated region body
PF: predicated region fallthrough
CT: control target
= control target key end

     0   :  { %s634_s12 = smov 0   ;;  %s833_s0 = inlined_call_operand.vmem [shape: f32[16,128], index: 0, kind: input, shape index: {}]   ;;  %s834_s1 = inlined_call_operand.vmem [shape: f32[384,128], index: 1, kind: input, shape index: {}]   ;;  %s835_s2 = inlined_call_operand.vmem [shape: f32[16,128], index: 2, kind: output, shape index: {0}]   ;;  %s836_s3 = inlined_call_operand.vmem [shape: f32[2,2,128], index: 3, kind: output, shape index: {1}]  }
   0x1 LB: > { %s491_s13 = sadd.s32 4294967295, %s610_s12   ;;  %p495_p0 = scmp.ge.s32.totalorder %s610_s12, 1  ;;  %s610_s12 = sphi %s634_s12, %s14_s12  }
   0x2   : > { %p139_p1 = scmp.lt.s32.totalorder %s610_s12, 3 }
   0x4   : > { %p140_p2 = pnand %p495_p0, %p139_p1 }
   0x5   : > { %p716_p3 = scmp.lt.s32.totalorder (!%p140_p2), %s491_s13, 1 }
   0x6   : > { %143 = sbr.rel (%p140_p2) target bundleno = 259 (0x103), region = 28 }
   0xb   : > { %v233_v0 = vld [vmem:[%s834_s1 + $0xf8] sm:$0xff]  ;;  %v232_v2 = vld [vmem:[%s834_s1 + $0xf0] sm:$0xff]  ;;  %v612_v3 = vmov 0.0   ;;  %v231_v6 = vld [vmem:[%s834_s1 + $0xe8] sm:$0xff]  ;;  %s839_s13 = smov (!%p716_p3, %s491_s13), 1  ;;  %v178_v32 = vlaneseq  ;;  %vm613_vm2 = vmmov 0  }
   0xc   : > { %v217_v1 = vld [vmem:[%s834_s1 + $0x78] sm:$0xff]  ;;  %507 = vmatprep.subr.mxu0 %v233_v0  ;;  %559 = vmatprep.subr.mxu1 %v612_v3  ;;  %v216_v4 = vld [vmem:[%s834_s1 + $0x70] sm:$0xff]  ;;  %v215_v8 = vld [vmem:[%s834_s1 + $0x68] sm:$0xff]  ;;  %s496_s6 = sshll.u32 %s839_s13, 3  ;;  %s498_s19 = sshll.u32 %s839_s13, 1  ;;  %vm404_vm3 = vcmask 1040384  }
   0xd   : > { %v249_v5 = vld [vmem:[%s834_s1 + $0x178] sm:$0xff]  ;;  %508 = vmatpush3.msra.mxu0 %v217_v1  ;;  %v248_v7 = vld [vmem:[%s834_s1 + $0x170] sm:$0xff]  ;;  %v247_v9 = vld [vmem:[%s834_s1 + $0x168] sm:$0xff]  ;;  %v179_v39 = vshrl.u32 %v178_v32, 7  ;;  %s168_s21 = scalar_lea.vmem %s833_s0, %s496_s6  ;;  %591 = vmatprep.mubr.msk.f32.mxu1 %vm613_vm2, %v612_v3  ;;  %s172_s18 = scalar_lea.vmem %s835_s2, %s496_s6 }
   0xe   : > { %560 = vmatpush3.msra.mxu1 %v249_v5  ;;  %509 = vmatprep.subr.mxu0 %v232_v2  ;;  %v230_v10 = vld [vmem:[%s834_s1 + $0xe0] sm:$0xff]  ;;  %v229_v13 = vld [vmem:[%s834_s1 + $0xd8] sm:$0xff]  ;;  %v228_v16 = vld [vmem:[%s834_s1 + $0xd0] sm:$0xff]  ;;  %s176_s6 = scalar_lea.vmem %s836_s3, %s498_s19 }
   0xf   : > { %561 = vmatprep.subr.mxu1 %v612_v3  ;;  %510 = vmatpush3.msra.mxu0 %v216_v4  ;;  %v214_v11 = vld [vmem:[%s834_s1 + $0x60] sm:$0xff]  ;;  %v213_v14 = vld [vmem:[%s834_s1 + $0x58] sm:$0xff]  ;;  %v212_v17 = vld [vmem:[%s834_s1 + $0x50] sm:$0xff]  ;;  %v184_v47 = vand.u32 7, %v179_v39 }
  0x10   : > { %562 = vmatpush3.msra.mxu1 %v248_v7  ;;  %511 = vmatprep.subr.mxu0 %v231_v6  ;;  %v246_v12 = vld [vmem:[%s834_s1 + $0x160] sm:$0xff]  ;;  %v245_v15 = vld [vmem:[%s834_s1 + $0x158] sm:$0xff]  ;;  %v244_v18 = vld [vmem:[%s834_s1 + $0x150] sm:$0xff] }
  0x11   : > { %563 = vmatprep.subr.mxu1 %v612_v3  ;;  %512 = vmatpush3.msra.mxu0 %v215_v8  ;;  %v227_v19 = vld [vmem:[%s834_s1 + $0xc8] sm:$0xff]  ;;  %v226_v22 = vld [vmem:[%s834_s1 + $0xc0] sm:$0xff]  ;;  %v225_v25 = vld [vmem:[%s834_s1 + $0xb8] sm:$0xff]  ;;  %vm505_vm0 = vcmp.ne.s32.totalorder %v184_v47, 0  ;;  %vm506_vm1 = vcmp.ne.s32.totalorder %v184_v47, 7 }
  0x12   : > { %564 = vmatpush3.msra.mxu1 %v247_v9  ;;  %513 = vmatprep.subr.mxu0 %v230_v10  ;;  %v211_v20 = vld [vmem:[%s834_s1 + $0x48] sm:$0xff]  ;;  %v210_v23 = vld [vmem:[%s834_s1 + $0x40] sm:$0xff]  ;;  %v209_v26 = vld [vmem:[%s834_s1 + $0x38] sm:$0xff] }
  0x13   : > { %565 = vmatprep.subr.mxu1 %v612_v3  ;;  %514 = vmatpush3.msra.mxu0 %v214_v11  ;;  %v243_v21 = vld [vmem:[%s834_s1 + $0x148] sm:$0xff]  ;;  %v242_v24 = vld [vmem:[%s834_s1 + $0x140] sm:$0xff]  ;;  %v241_v27 = vld [vmem:[%s834_s1 + $0x138] sm:$0xff] }
  0x14   : > { %566 = vmatpush3.msra.mxu1 %v246_v12  ;;  %515 = vmatprep.subr.mxu0 %v229_v13  ;;  %v224_v28 = vld [vmem:[%s834_s1 + $0xb0] sm:$0xff]  ;;  %v223_v31 = vld [vmem:[%s834_s1 + $0xa8] sm:$0xff]  ;;  %v222_v35 = vld [vmem:[%s834_s1 + $0xa0] sm:$0xff] }
  0x15   : > { %567 = vmatprep.subr.mxu1 %v612_v3  ;;  %516 = vmatpush3.msra.mxu0 %v213_v14  ;;  %v208_v29 = vld [vmem:[%s834_s1 + $0x30] sm:$0xff]  ;;  %v207_v33 = vld [vmem:[%s834_s1 + $0x28] sm:$0xff]  ;;  %v206_v36 = vld [vmem:[%s834_s1 + $0x20] sm:$0xff] }
  0x16   : > { %568 = vmatpush3.msra.mxu1 %v245_v15  ;;  %517 = vmatprep.subr.mxu0 %v228_v16  ;;  %v240_v30 = vld [vmem:[%s834_s1 + $0x130] sm:$0xff]  ;;  %v239_v34 = vld [vmem:[%s834_s1 + $0x128] sm:$0xff]  ;;  %v238_v37 = vld [vmem:[%s834_s1 + $0x120] sm:$0xff] }
  0x17   : > { %569 = vmatprep.subr.mxu1 %v612_v3  ;;  %518 = vmatpush3.msra.mxu0 %v212_v17  ;;  %v221_v38 = vld [vmem:[%s834_s1 + $0x98] sm:$0xff]  ;;  %v220_v42 = vld [vmem:[%s834_s1 + $0x90] sm:$0xff]  ;;  %v219_v45 = vld [vmem:[%s834_s1 + $0x88] sm:$0xff] }
  0x18   : > { %570 = vmatpush3.msra.mxu1 %v244_v18  ;;  %519 = vmatprep.subr.mxu0 %v227_v19  ;;  %v205_v40 = vld [vmem:[%s834_s1 + $0x18] sm:$0xff]  ;;  %v204_v43 = vld [vmem:[%s834_s1 + $0x10] sm:$0xff]  ;;  %v177_v46 = vld [vmem:[%s168_s21] sm:$0xff] }
  0x19   : > { %571 = vmatprep.subr.mxu1 %v612_v3  ;;  %520 = vmatpush3.msra.mxu0 %v211_v20  ;;  %v237_v41 = vld [vmem:[%s834_s1 + $0x118] sm:$0xff]  ;;  %v236_v44 = vld [vmem:[%s834_s1 + $0x110] sm:$0xff]  ;;  %v203_v48 = vld [vmem:[%s834_s1 + $0x8] sm:$0xff]  ;;  %v193_v52 = vrot.slane %v177_v46, 7  ;;  %v198_v54 = vrot.slane %v177_v46, 1 }
  0x1a   : > { %572 = vmatpush3.msra.mxu1 %v243_v21  ;;  %521 = vmatprep.subr.mxu0 %v226_v22  ;;  %v218_v49 = vld [vmem:[%s834_s1 + $0x80] sm:$0xff]  ;;  %v235_v50 = vld [vmem:[%s834_s1 + $0x108] sm:$0xff] }
  0x1b   : > { %573 = vmatprep.subr.mxu1 %v612_v3  ;;  %522 = vmatpush3.msra.mxu0 %v210_v23  ;;  %v202_v51 = vld [vmem:[%s834_s1] sm:$0xff] }
  0x1c   : > { %574 = vmatpush3.msra.mxu1 %v242_v24  ;;  %523 = vmatprep.subr.mxu0 %v225_v25  ;;  %v234_v53 = vld [vmem:[%s834_s1 + $0x100] sm:$0xff] }
  0x1d   : > { %575 = vmatprep.subr.mxu1 %v612_v3  ;;  %524 = vmatpush3.msra.mxu0 %v209_v26 }
  0x1e   : > { %576 = vmatpush3.msra.mxu1 %v241_v27  ;;  %525 = vmatprep.subr.mxu0 %v224_v28 }
  0x1f   : > { %577 = vmatprep.subr.mxu1 %v612_v3  ;;  %526 = vmatpush3.msra.mxu0 %v208_v29 }
  0x20   : > { %578 = vmatpush3.msra.mxu1 %v240_v30  ;;  %527 = vmatprep.subr.mxu0 %v223_v31 }
  0x21   : > { %579 = vmatprep.subr.mxu1 %v612_v3  ;;  %528 = vmatpush3.msra.mxu0 %v207_v33 }
  0x22   : > { %580 = vmatpush3.msra.mxu1 %v239_v34  ;;  %529 = vmatprep.subr.mxu0 %v222_v35 }
  0x23   : > { %581 = vmatprep.subr.mxu1 %v612_v3  ;;  %530 = vmatpush3.msra.mxu0 %v206_v36 }
  0x24   : > { %582 = vmatpush3.msra.mxu1 %v238_v37  ;;  %531 = vmatprep.subr.mxu0 %v221_v38 }
  0x25   : > { %583 = vmatprep.subr.mxu1 %v612_v3  ;;  %532 = vmatpush3.msra.mxu0 %v205_v40 }
  0x26   : > { %584 = vmatpush3.msra.mxu1 %v237_v41  ;;  %533 = vmatprep.subr.mxu0 %v220_v42 }
  0x27   : > { %585 = vmatprep.subr.mxu1 %v612_v3  ;;  %534 = vmatpush3.msra.mxu0 %v204_v43 }
  0x28   : > { %586 = vmatpush3.msra.mxu1 %v236_v44  ;;  %535 = vmatprep.subr.mxu0 %v219_v45 }
  0x29   : > { %587 = vmatprep.subr.mxu1 %v612_v3  ;;  %536 = vmatpush3.msra.mxu0 %v203_v48 }
  0x2a   : > { %314 = vmatprep.mubr.f32.mxu0 %v177_v46  ;;  %537 = vmatprep.subr.mxu0 %v218_v49 }
  0x2b   : > { %588 = vmatpush3.msra.mxu1 %v235_v50  ;;  %538 = vmatpush3.msra.mxu0 %v202_v51 }
  0x2c   : > { %589 = vmatprep.subr.mxu1 %v612_v3  ;;  %500 = vmatmul.mubr.msk.f32.vlgmr.msra.gmra.mxu0 %vm505_vm0, %v193_v52 }
  0x2d   : > { %590 = vmatpush3.msra.mxu1 %v234_v53 }
  0x2e   : > { %592 = vmatmul.mubr.msk.f32.vlgmr.msra.gmra.mxu1 %vm506_vm1, %v198_v54 }
  0xec   : > { %v539_v55 = vpop.f32.mrf.mxu0 }
  0xee   : > { %v540_v56 = vpop.f32.mrf.mxu0  ;;  %v386_v57 = vpop.f32.mrf.mxu1 }
  0xef   : > { %v541_v58 = vadd.f32 %v540_v56, %v539_v55 }
  0xf0   : > { %v593_v59 = vpop.f32.mrf.mxu1 }
  0xf1   : > { %v387_v60 = vadd.f32 %v541_v58, %v386_v57 }
  0xf3   : > { %390 = vst [vmem:[%s172_s18] sm:$0xff] %v387_v60  ;;  %v391_v61 = vrot.slane %v387_v60, 4  ;;  %v397_v62 = vmul.f32 %v387_v60, %v387_v60 }
  0xf5   : > { %v392_v63 = vadd.f32 %v391_v61, %v387_v60  ;;  %v398_v0 = vrot.slane %v397_v62, 4 }
  0xf7   : > { %v393_v1 = vrot.slane %v392_v63, 2  ;;  %v399_v2 = vadd.f32 %v398_v0, %v397_v62 }
  0xf9   : > { %v394_v3 = vadd.f32 %v393_v1, %v392_v63  ;;  %v400_v4 = vrot.slane %v399_v2, 2 }
  0xfb   : > { %v395_v5 = vrot.slane %v394_v3, 1  ;;  %v401_v6 = vadd.f32 %v400_v4, %v399_v2 }
  0xfd   : > { %v402_v7 = vrot.slane %v401_v6, 1  ;;  %v396_v8 = vadd.f32 %v395_v5, %v394_v3 }
  0xff   : > { %v403_v9 = vadd.f32 %v402_v7, %v401_v6 }
 0x101   : > { %v405_v10 = vsel %vm404_vm3, %v396_v8, %v403_v9 }
 0x102   : > { %406 = vst [vmem:[%s176_s6] sm:$0x3] %v405_v10 }
 0x103 PF: > { %s14_s12 = sadd.s32 1, %s610_s12  }
 0x104   : > { %p11_p4 = scmp.ge.s32.totalorder %s14_s12, 4  }
 0x106   :  { %13 = sbr.rel (!%p11_p4) target bundleno = 1 (0x1), region = 70 }

// kernel: residual_block.3
= control target key start
LH: loop header
LB: loop body
LE: loop exit
PB: predicated region body
PF: predicated region fallthrough
CT: control target
= control target key end

     0   :  { %s717_s18 = smov 0   ;;  %s918_s0 = inlined_call_operand.vmem [shape: f32[16,128], index: 0, kind: input, shape index: {}]   ;;  %s919_s1 = inlined_call_operand.vmem [shape: f32[384,128], index: 1, kind: input, shape index: {}]   ;;  %s920_s2 = inlined_call_operand.vmem [shape: f32[1,128], index: 2, kind: input, shape index: {}]   ;;  %s921_s3 = inlined_call_operand.vmem [shape: f32[1,128], index: 3, kind: input, shape index: {}]   ;;  %s922_s4 = inlined_call_operand.vmem [shape: f32[16,128], index: 4, kind: output, shape index: {0}]   ;;  %s923_s5 = inlined_call_operand.vmem [shape: f32[2,2,128], index: 5, kind: output, shape index: {1}]  }
   0x1 LB: > { %s562_s19 = sadd.s32 4294967295, %s683_s18   ;;  %p566_p0 = scmp.ge.s32.totalorder %s683_s18, 1  ;;  %s683_s18 = sphi %s717_s18, %s16_s18  }
   0x2   : > { %p189_p1 = scmp.lt.s32.totalorder %s683_s18, 3 }
   0x4   : > { %p190_p2 = pnand %p566_p0, %p189_p1 }
   0x5   : > { %p741_p3 = scmp.lt.s32.totalorder (!%p190_p2), %s562_s19, 1 }
   0x6   : > { %193 = sbr.rel (%p190_p2) target bundleno = 259 (0x103), region = 36 }
   0xb   : > { %v304_v0 = vld [vmem:[%s919_s1 + $0xf8] sm:$0xff]  ;;  %v303_v2 = vld [vmem:[%s919_s1 + $0xf0] sm:$0xff]  ;;  %v685_v3 = vmov 0.0   ;;  %v302_v6 = vld [vmem:[%s919_s1 + $0xe8] sm:$0xff]  ;;  %s926_s19 = smov (!%p741_p3, %s562_s19), 1  ;;  %v249_v36 = vlaneseq  ;;  %vm686_vm2 = vmmov 0  }
   0xc   : > { %v288_v1 = vld [vmem:[%s919_s1 + $0x78] sm:$0xff]  ;;  %580 = vmatprep.subr.mxu0 %v304_v0  ;;  %632 = vmatprep.subr.mxu1 %v685_v3  ;;  %v287_v4 = vld [vmem:[%s919_s1 + $0x70] sm:$0xff]  ;;  %v286_v8 = vld [vmem:[%s919_s1 + $0x68] sm:$0xff]  ;;  %s567_s9 = sshll.u32 %s926_s19, 3  ;;  %s569_s14 = sshll.u32 %s926_s19, 1  ;;  %vm475_vm3 = vcmask 1040384  }
   0xd   : > { %v320_v5 = vld [vmem:[%s919_s1 + $0x178] sm:$0xff]  ;;  %581 = vmatpush3.msra.mxu0 %v288_v1  ;;  %v319_v7 = vld [vmem:[%s919_s1 + $0x170] sm:$0xff]  ;;  %v318_v9 = vld [vmem:[%s919_s1 + $0x168] sm:$0xff]  ;;  %s222_s22 = scalar_lea.vmem %s918_s0, %s567_s9  ;;  %v250_v44 = vshrl.u32 %v249_v36, 7  ;;  %664 = vmatprep.mubr.msk.f32.mxu1 %vm686_vm2, %v685_v3  ;;  %s226_s13 = scalar_lea.vmem %s922_s4, %s567_s9 }
   0xe   : > { %633 = vmatpush3.msra.mxu1 %v320_v5  ;;  %582 = vmatprep.subr.mxu0 %v303_v2  ;;  %v301_v10 = vld [vmem:[%s919_s1 + $0xe0] sm:$0xff]  ;;  %v300_v13 = vld [vmem:[%s919_s1 + $0xd8] sm:$0xff]  ;;  %v299_v16 = vld [vmem:[%s919_s1 + $0xd0] sm:$0xff]  ;;  %s230_s9 = scalar_lea.vmem %s923_s5, %s569_s14 }
   0xf   : > { %634 = vmatprep.subr.mxu1 %v685_v3  ;;  %583 = vmatpush3.msra.mxu0 %v287_v4  ;;  %v285_v11 = vld [vmem:[%s919_s1 + $0x60] sm:$0xff]  ;;  %v284_v14 = vld [vmem:[%s919_s1 + $0x58] sm:$0xff]  ;;  %v283_v17 = vld [vmem:[%s919_s1 + $0x50] sm:$0xff]  ;;  %v255_v52 = vand.u32 7, %v250_v44 }
  0x10   : > { %635 = vmatpush3.msra.mxu1 %v319_v7  ;;  %584 = vmatprep.subr.mxu0 %v302_v6  ;;  %v317_v12 = vld [vmem:[%s919_s1 + $0x160] sm:$0xff]  ;;  %v316_v15 = vld [vmem:[%s919_s1 + $0x158] sm:$0xff]  ;;  %v315_v18 = vld [vmem:[%s919_s1 + $0x150] sm:$0xff] }
  0x11   : > { %636 = vmatprep.subr.mxu1 %v685_v3  ;;  %585 = vmatpush3.msra.mxu0 %v286_v8  ;;  %v298_v19 = vld [vmem:[%s919_s1 + $0xc8] sm:$0xff]  ;;  %v297_v22 = vld [vmem:[%s919_s1 + $0xc0] sm:$0xff]  ;;  %v296_v25 = vld [vmem:[%s919_s1 + $0xb8] sm:$0xff]  ;;  %vm578_vm0 = vcmp.ne.s32.totalorder %v255_v52, 0  ;;  %vm579_vm1 = vcmp.ne.s32.totalorder %v255_v52, 7 }
  0x12   : > { %637 = vmatpush3.msra.mxu1 %v318_v9  ;;  %586 = vmatprep.subr.mxu0 %v301_v10  ;;  %v282_v20 = vld [vmem:[%s919_s1 + $0x48] sm:$0xff]  ;;  %v281_v23 = vld [vmem:[%s919_s1 + $0x40] sm:$0xff]  ;;  %v280_v26 = vld [vmem:[%s919_s1 + $0x38] sm:$0xff] }
  0x13   : > { %638 = vmatprep.subr.mxu1 %v685_v3  ;;  %587 = vmatpush3.msra.mxu0 %v285_v11  ;;  %v314_v21 = vld [vmem:[%s919_s1 + $0x148] sm:$0xff]  ;;  %v313_v24 = vld [vmem:[%s919_s1 + $0x140] sm:$0xff]  ;;  %v312_v27 = vld [vmem:[%s919_s1 + $0x138] sm:$0xff] }
  0x14   : > { %639 = vmatpush3.msra.mxu1 %v317_v12  ;;  %588 = vmatprep.subr.mxu0 %v300_v13  ;;  %v231_v28 = vld [vmem:[%s222_s22] sm:$0xff]  ;;  %v295_v30 = vld [vmem:[%s919_s1 + $0xb0] sm:$0xff]  ;;  %v294_v34 = vld [vmem:[%s919_s1 + $0xa8] sm:$0xff] }
  0x15   : > { %640 = vmatprep.subr.mxu1 %v685_v3  ;;  %589 = vmatpush3.msra.mxu0 %v284_v14  ;;  %v570_v29 = vld [vmem:[%s920_s2] ss:$0 sm:$0xff]  ;;  %v279_v31 = vld [vmem:[%s919_s1 + $0x30] sm:$0xff]  ;;  %v278_v37 = vld [vmem:[%s919_s1 + $0x28] sm:$0xff] }
  0x16   : > { %641 = vmatpush3.msra.mxu1 %v316_v15  ;;  %590 = vmatprep.subr.mxu0 %v299_v16  ;;  %v311_v32 = vld [vmem:[%s919_s1 + $0x130] sm:$0xff]  ;;  %v239_v33 = vmul.f32 %v570_v29, %v231_v28  ;;  %v571_v35 = vld [vmem:[%s921_s3] ss:$0 sm:$0xff]  ;;  %v310_v38 = vld [vmem:[%s919_s1 + $0x128] sm:$0xff] }
  0x17   : > { %642 = vmatprep.subr.mxu1 %v685_v3  ;;  %591 = vmatpush3.msra.mxu0 %v283_v17  ;;  %v293_v39 = vld [vmem:[%s919_s1 + $0xa0] sm:$0xff]  ;;  %v292_v43 = vld [vmem:[%s919_s1 + $0x98] sm:$0xff]  ;;  %v291_v47 = vld [vmem:[%s919_s1 + $0x90] sm:$0xff] }
  0x18   : > { %643 = vmatpush3.msra.mxu1 %v315_v18  ;;  %592 = vmatprep.subr.mxu0 %v298_v19  ;;  %v277_v40 = vld [vmem:[%s919_s1 + $0x20] sm:$0xff]  ;;  %v247_v42 = vadd.f32 %v571_v35, %v239_v33  ;;  %v276_v45 = vld [vmem:[%s919_s1 + $0x18] sm:$0xff]  ;;  %v275_v48 = vld [vmem:[%s919_s1 + $0x10] sm:$0xff] }
  0x19   : > { %644 = vmatprep.subr.mxu1 %v685_v3  ;;  %593 = vmatpush3.msra.mxu0 %v282_v20  ;;  %v309_v41 = vld [vmem:[%s919_s1 + $0x120] sm:$0xff]  ;;  %v308_v46 = vld [vmem:[%s919_s1 + $0x118] sm:$0xff]  ;;  %v307_v49 = vld [vmem:[%s919_s1 + $0x110] sm:$0xff] }
  0x1a   : > { %645 = vmatpush3.msra.mxu1 %v314_v21  ;;  %594 = vmatprep.subr.mxu0 %v297_v22  ;;  %v248_v50 = vmax.f32 %v247_v42, 0.0  ;;  %v290_v51 = vld [vmem:[%s919_s1 + $0x88] sm:$0xff]  ;;  %v289_v54 = vld [vmem:[%s919_s1 + $0x80] sm:$0xff] }
  0x1b   : > { %646 = vmatprep.subr.mxu1 %v685_v3  ;;  %595 = vmatpush3.msra.mxu0 %v281_v23  ;;  %v274_v53 = vld [vmem:[%s919_s1 + $0x8] sm:$0xff]  ;;  %v273_v56 = vld [vmem:[%s919_s1] sm:$0xff] }
  0x1c   : > { %647 = vmatpush3.msra.mxu1 %v313_v24  ;;  %596 = vmatprep.subr.mxu0 %v296_v25  ;;  %v306_v55 = vld [vmem:[%s919_s1 + $0x108] sm:$0xff]  ;;  %v264_v57 = vrot.slane %v248_v50, 7  ;;  %v305_v58 = vld [vmem:[%s919_s1 + $0x100] sm:$0xff]  ;;  %v269_v59 = vrot.slane %v248_v50, 1 }
  0x1d   : > { %648 = vmatprep.subr.mxu1 %v685_v3  ;;  %597 = vmatpush3.msra.mxu0 %v280_v26 }
  0x1e   : > { %649 = vmatpush3.msra.mxu1 %v312_v27  ;;  %598 = vmatprep.subr.mxu0 %v295_v30 }
  0x1f   : > { %650 = vmatprep.subr.mxu1 %v685_v3  ;;  %599 = vmatpush3.msra.mxu0 %v279_v31 }
  0x20   : > { %651 = vmatpush3.msra.mxu1 %v311_v32  ;;  %600 = vmatprep.subr.mxu0 %v294_v34 }
  0x21   : > { %652 = vmatprep.subr.mxu1 %v685_v3  ;;  %601 = vmatpush3.msra.mxu0 %v278_v37 }
  0x22   : > { %653 = vmatpush3.msra.mxu1 %v310_v38  ;;  %602 = vmatprep.subr.mxu0 %v293_v39 }
  0x23   : > { %654 = vmatprep.subr.mxu1 %v685_v3  ;;  %603 = vmatpush3.msra.mxu0 %v277_v40 }
  0x24   : > { %655 = vmatpush3.msra.mxu1 %v309_v41  ;;  %604 = vmatprep.subr.mxu0 %v292_v43 }
  0x25   : > { %656 = vmatprep.subr.mxu1 %v685_v3  ;;  %605 = vmatpush3.msra.mxu0 %v276_v45 }
  0x26   : > { %657 = vmatpush3.msra.mxu1 %v308_v46  ;;  %606 = vmatprep.subr.mxu0 %v291_v47 }
  0x27   : > { %658 = vmatprep.subr.mxu1 %v685_v3  ;;  %607 = vmatpush3.msra.mxu0 %v275_v48 }
  0x28   : > { %659 = vmatpush3.msra.mxu1 %v307_v49  ;;  %608 = vmatprep.subr.mxu0 %v290_v51 }
  0x29   : > { %660 = vmatprep.subr.mxu1 %v685_v3  ;;  %609 = vmatpush3.msra.mxu0 %v274_v53 }
  0x2a   : > { %385 = vmatprep.mubr.f32.mxu0 %v248_v50  ;;  %610 = vmatprep.subr.mxu0 %v289_v54 }
  0x2b   : > { %661 = vmatpush3.msra.mxu1 %v306_v55  ;;  %611 = vmatpush3.msra.mxu0 %v273_v56 }
  0x2c   : > { %662 = vmatprep.subr.mxu1 %v685_v3  ;;  %573 = vmatmul.mubr.msk.f32.vlgmr.msra.gmra.mxu0 %vm578_vm0, %v264_v57 }
  0x2d   : > { %663 = vmatpush3.msra.mxu1 %v305_v58 }
  0x2e   : > { %665 = vmatmul.mubr.msk.f32.vlgmr.msra.gmra.mxu1 %vm579_vm1, %v269_v59 }
  0xec   : > { %v612_v60 = vpop.f32.mrf.mxu0 }
  0xee   : > { %v613_v61 = vpop.f32.mrf.mxu0  ;;  %v457_v62 = vpop.f32.mrf.mxu1 }
  0xef   : > { %v614_v63 = vadd.f32 %v613_v61, %v612_v60 }
  0xf0   : > { %v666_v0 = vpop.f32.mrf.mxu1 }
  0xf1   : > { %v458_v1 = vadd.f32 %v614_v63, %v457_v62 }
  0xf3   : > { %461 = vst [vmem:[%s226_s13] sm:$0xff] %v458_v1  ;;  %v462_v2 = vrot.slane %v458_v1, 4  ;;  %v468_v4 = vmul.f32 %v458_v1, %v458_v1 }
  0xf5   : > { %v463_v5 = vadd.f32 %v462_v2, %v458_v1  ;;  %v469_v6 = vrot.slane %v468_v4, 4 }
  0xf7   : > { %v464_v7 = vrot.slane %v463_v5, 2  ;;  %v470_v3 = vadd.f32 %v469_v6, %v468_v4 }
  0xf9   : > { %v465_v8 = vadd.f32 %v464_v7, %v463_v5  ;;  %v471_v9 = vrot.slane %v470_v3, 2 }
  0xfb   : > { %v466_v10 = vrot.slane %v465_v8, 1  ;;  %v472_v11 = vadd.f32 %v471_v9, %v470_v3 }
  0xfd   : > { %v473_v12 = vrot.slane %v472_v11, 1  ;;  %v467_v13 = vadd.f32 %v466_v10, %v465_v8 }
  0xff   : > { %v474_v14 = vadd.f32 %v473_v12, %v472_v11 }
 0x101   : > { %v476_v15 = vsel %vm475_vm3, %v467_v13, %v474_v14 }
 0x102   : > { %477 = vst [vmem:[%s230_s9] sm:$0x3] %v476_v15 }
 0x103 PF: > { %s16_s18 = sadd.s32 1, %s683_s18  }
 0x104   : > { %p13_p4 = scmp.ge.s32.totalorder %s16_s18, 4  }
 0x106   :  { %15 = sbr.rel (!%p13_p4) target bundleno = 1 (0x1), region = 78 }

</bundles_post_ra>
